<compile_context>
chip_gen: v7x
topology: tpu7x:2x2x1
jax: 0.10.0
libtpu: 0.0.40
codegen_flags: <defaults>
</compile_context>

<pallas_src>
import math
from functools import partial

import jax
import jax.numpy as jnp
from jax.experimental import pallas as pl
from jax.experimental.pallas import tpu as pltpu

TORCH_PI = 3.1415926536
SQRT_2_OVER_PI = math.sqrt(2.0 / TORCH_PI)

LANE = 128      # vreg lane width (last dim)
SUBLANE = 8     # vreg sublane count for f32 (second-to-last dim)


def _round_up(n, m):
    return ((n + m - 1) // m) * m


def _gelu_tanh(y):
    # MyGELU.forward: 0.5*y*(1 + tanh(sqrt(2/pi)*(y + 0.044715*y^3))); tanh -> EUP slot.
    y2 = y * y
    return 0.5 * y * (1.0 + jnp.tanh(SQRT_2_OVER_PI * (y + 0.044715 * (y * y2))))


def _make_fused_mlp_kernel(depth):
    """kernel(x_ref [tm,D], w_ref [depth,D,D], b_ref [depth,1,D], o_ref [tm,D])."""

    def kernel(x_ref, w_ref, b_ref, o_ref):
        h = x_ref[...]
        for i in range(depth):                       # statically unrolled
            w = w_ref[i]                             # [D, D], static index
            # MXU matmul with f32 accumulation; bias add + GELU stay in f32 (v5e-safe).
            h = jnp.dot(h.astype(w.dtype), w, preferred_element_type=jnp.float32)
            h = h + b_ref[i]                         # [1, D] broadcast
            if i != depth - 1:
                h = _gelu_tanh(h)
        o_ref[...] = h.astype(o_ref.dtype)

    return kernel


def pad_and_stack_params(params, weight_dtype=jnp.float32):
    """Done ONCE at param-load time; result is cached and reused every forward call.

    params: list of (w [din_i, dout_i], b [1, dout_i]) with w = torch_W.T layout.
    Returns (w_stack [depth, D, D], b_stack [depth, 1, D]) zero-padded, lane-dense.
    """
    depth = len(params)
    dims = [params[0][0].shape[0]] + [w.shape[1] for w, _ in params]
    D = max(_round_up(d, LANE) for d in dims)
    w_stack = jnp.zeros((depth, D, D), weight_dtype)
    b_stack = jnp.zeros((depth, 1, D), jnp.float32)
    for i, (w, b) in enumerate(params):
        din, dout = w.shape
        w_stack = w_stack.at[i, :din, :dout].set(w.astype(weight_dtype))
        b_stack = b_stack.at[i, :, :dout].set(b)
    return w_stack, b_stack


@partial(jax.jit, static_argnames=("dout",))
def fused_mlp(x, w_stack, b_stack, *, dout):
    """x: [B, Din] f32; w_stack: [depth, D, D]; b_stack: [depth, 1, D] -> [B, dout]."""
    depth, D, _ = w_stack.shape
    B, Din = x.shape

    # Batch tiling: sublane-dense, one block for small B, 256-row tiles for large B.
    Bp = _round_up(B, SUBLANE)
    tm = Bp if Bp <= 256 else 256
    Bp = _round_up(Bp, tm)

    # Pad x inside this jit so the pad fuses with the kernel launch (no extra HBM trip).
    x_p = jnp.zeros((Bp, D), jnp.float32).at[:B, :Din].set(x)

    flops = 2 * Bp * D * D * depth
    bytes_accessed = (x_p.size * 4 + w_stack.size * w_stack.dtype.itemsize
                      + b_stack.size * 4 + Bp * D * 4)

    out_p = pl.pallas_call(
        _make_fused_mlp_kernel(depth),
        out_shape=jax.ShapeDtypeStruct((Bp, D), jnp.float32),
        grid_spec=pltpu.PrefetchScalarGridSpec(
            num_scalar_prefetch=0,
            grid=(Bp // tm,),
            in_specs=[
                pl.BlockSpec((tm, D), lambda i: (i, 0)),          # x: tiled over batch
                pl.BlockSpec((depth, D, D), lambda i: (0, 0, 0)),  # weights: VMEM-resident
                pl.BlockSpec((depth, 1, D), lambda i: (0, 0, 0)),  # biases:  VMEM-resident
            ],
            out_specs=pl.BlockSpec((tm, D), lambda i: (i, 0)),
        ),
        compiler_params=pltpu.CompilerParams(
            dimension_semantics=("parallel",),
        ),
        cost_estimate=pl.CostEstimate(
            flops=flops,
            transcendentals=Bp * D * (depth - 1),
            bytes_accessed=bytes_accessed,
        ),
    )(x_p, w_stack, b_stack)

    # Slice fuses into the enclosing jit (same program as the pallas call).
    return out_p[:B, :dout]


def init_net_params(key, layer_sizes):
    """Deterministic init mimicking torch.nn.Linear default U(-1/sqrt(fan_in), +)."""
    params = []
    for i in range(len(layer_sizes) - 1):
        din, dout = layer_sizes[i], layer_sizes[i + 1]
        key, kw, kb = jax.random.split(key, 3)
        bound = 1.0 / math.sqrt(din)
        w = jax.random.uniform(kw, (din, dout), jnp.float32, -bound, bound)
        b = jax.random.uniform(kb, (1, dout), jnp.float32, -bound, bound)
        params.append((w, b))
    return params


def _reference_forward(x, params):
    h = x
    for i, (w, b) in enumerate(params):
        h = h @ w + b
        if i != len(params) - 1:
            h = 0.5 * h * (1.0 + jnp.tanh(SQRT_2_OVER_PI * (h + 0.044715 * h**3)))
    return h


if __name__ == "__main__":
    # `layers` for the synthetic Net (MLP widths): Linear(32,64) GELU Linear(64,64) GELU Linear(64,16)
    layers = [32, 64, 64, 16]
    batch = 8

    key = jax.random.PRNGKey(0)
    key, kx = jax.random.split(key)
    x = jax.random.normal(kx, (batch, layers[0]), jnp.float32)

    params = init_net_params(key, layers)

    # Pre-pad + stack ONCE (cached padded params; reused for every forward call).
    w_stack, b_stack = pad_and_stack_params(params, weight_dtype=jnp.float32)

    out = fused_mlp(x, w_stack, b_stack, dout=layers[-1])
    out = jax.block_until_ready(out)

    # Sanity check against a pure-JAX reference (f32 path is exact up to padding noise-free).
    ref = _reference_forward(x, params)
    assert out.shape == (batch, layers[-1])
    assert jnp.allclose(out, ref, atol=1e-5, rtol=1e-5), "mismatch vs reference"

    print("KERNEL_OK")
</pallas_src>

<mosaic_0001>
module attributes {stable_mosaic.version = 11 : i64} {
  func.func @kernel(%arg0: i32, %arg1: memref<8x128xf32, #tpu.memory_space<vmem>>, %arg2: memref<3x128x128xf32, #tpu.memory_space<vmem>>, %arg3: memref<3x1x128xf32, #tpu.memory_space<vmem>>, %arg4: memref<8x128xf32, #tpu.memory_space<vmem>>) attributes {dimension_semantics = [#tpu.dimension_semantics<parallel>], iteration_bounds = array<i64: 1>, scalar_prefetch = 0 : i64, scratch_operands = 0 : i64, tpu.core_type = #tpu.core_type<tc>, window_params = [{transform_indices = @transform_0, window_bounds = array<i64: 8, 128>}, {pipeline_mode = #tpu.pipeline_mode<synchronous>, transform_indices = @transform_1, window_bounds = array<i64: 3, 128, 128>}, {pipeline_mode = #tpu.pipeline_mode<synchronous>, transform_indices = @transform_2, window_bounds = array<i64: 3, 1, 128>}, {transform_indices = @transform_3, window_bounds = array<i64: 8, 128>}]} {
    %c0 = arith.constant 0 : index
    %c0_0 = arith.constant 0 : index
    %0 = vector.load %arg1[%c0, %c0_0] : memref<8x128xf32, #tpu.memory_space<vmem>>, vector<8x128xf32>
    %c0_1 = arith.constant 0 : index
    %c0_2 = arith.constant 0 : index
    %c0_3 = arith.constant 0 : index
    %1 = vector.load %arg2[%c0_1, %c0_2, %c0_3] : memref<3x128x128xf32, #tpu.memory_space<vmem>>, vector<1x128x128xf32>
    %2 = vector.shape_cast %1 : vector<1x128x128xf32> to vector<128x128xf32>
    %cst = arith.constant dense<0.000000e+00> : vector<8x128xf32>
    %3 = tpu.matmul %0, %2, %cst {dimension_numbers = #tpu.dot_dimension_numbers<[1], [0], [0], [1], [0, 0, 1, 1], [], []>} : vector<8x128xf32>, vector<128x128xf32>, vector<8x128xf32> -> vector<8x128xf32>
    %c0_4 = arith.constant 0 : index
    %c0_5 = arith.constant 0 : index
    %c0_6 = arith.constant 0 : index
    %4 = vector.load %arg3[%c0_4, %c0_5, %c0_6] : memref<3x1x128xf32, #tpu.memory_space<vmem>>, vector<1x1x128xf32>
    %5 = vector.shape_cast %4 : vector<1x1x128xf32> to vector<1x128xf32>
    %6 = vector.broadcast %5 : vector<1x128xf32> to vector<8x128xf32>
    %7 = arith.addf %3, %6 : vector<8x128xf32>
    %8 = arith.mulf %7, %7 : vector<8x128xf32>
    %cst_7 = arith.constant 5.000000e-01 : f32
    %9 = vector.broadcast %cst_7 : f32 to vector<8x128xf32>
    %10 = arith.mulf %9, %7 : vector<8x128xf32>
    %11 = arith.mulf %7, %8 : vector<8x128xf32>
    %cst_8 = arith.constant 4.471500e-02 : f32
    %12 = vector.broadcast %cst_8 : f32 to vector<8x128xf32>
    %13 = arith.mulf %12, %11 : vector<8x128xf32>
    %14 = arith.addf %7, %13 : vector<8x128xf32>
    %cst_9 = arith.constant 0.797884583 : f32
    %15 = vector.broadcast %cst_9 : f32 to vector<8x128xf32>
    %16 = arith.mulf %15, %14 : vector<8x128xf32>
    %17 = math.tanh %16 : vector<8x128xf32>
    %cst_10 = arith.constant 1.000000e+00 : f32
    %18 = vector.broadcast %cst_10 : f32 to vector<8x128xf32>
    %19 = arith.addf %18, %17 : vector<8x128xf32>
    %20 = arith.mulf %10, %19 : vector<8x128xf32>
    %c1 = arith.constant 1 : index
    %c0_11 = arith.constant 0 : index
    %c0_12 = arith.constant 0 : index
    %21 = vector.load %arg2[%c1, %c0_11, %c0_12] : memref<3x128x128xf32, #tpu.memory_space<vmem>>, vector<1x128x128xf32>
    %22 = vector.shape_cast %21 : vector<1x128x128xf32> to vector<128x128xf32>
    %cst_13 = arith.constant dense<0.000000e+00> : vector<8x128xf32>
    %23 = tpu.matmul %20, %22, %cst_13 {dimension_numbers = #tpu.dot_dimension_numbers<[1], [0], [0], [1], [0, 0, 1, 1], [], []>} : vector<8x128xf32>, vector<128x128xf32>, vector<8x128xf32> -> vector<8x128xf32>
    %c1_14 = arith.constant 1 : index
    %c0_15 = arith.constant 0 : index
    %c0_16 = arith.constant 0 : index
    %24 = vector.load %arg3[%c1_14, %c0_15, %c0_16] : memref<3x1x128xf32, #tpu.memory_space<vmem>>, vector<1x1x128xf32>
    %25 = vector.shape_cast %24 : vector<1x1x128xf32> to vector<1x128xf32>
    %26 = vector.broadcast %25 : vector<1x128xf32> to vector<8x128xf32>
    %27 = arith.addf %23, %26 : vector<8x128xf32>
    %28 = arith.mulf %27, %27 : vector<8x128xf32>
    %cst_17 = arith.constant 5.000000e-01 : f32
    %29 = vector.broadcast %cst_17 : f32 to vector<8x128xf32>
    %30 = arith.mulf %29, %27 : vector<8x128xf32>
    %31 = arith.mulf %27, %28 : vector<8x128xf32>
    %cst_18 = arith.constant 4.471500e-02 : f32
    %32 = vector.broadcast %cst_18 : f32 to vector<8x128xf32>
    %33 = arith.mulf %32, %31 : vector<8x128xf32>
    %34 = arith.addf %27, %33 : vector<8x128xf32>
    %cst_19 = arith.constant 0.797884583 : f32
    %35 = vector.broadcast %cst_19 : f32 to vector<8x128xf32>
    %36 = arith.mulf %35, %34 : vector<8x128xf32>
    %37 = math.tanh %36 : vector<8x128xf32>
    %cst_20 = arith.constant 1.000000e+00 : f32
    %38 = vector.broadcast %cst_20 : f32 to vector<8x128xf32>
    %39 = arith.addf %38, %37 : vector<8x128xf32>
    %40 = arith.mulf %30, %39 : vector<8x128xf32>
    %c2 = arith.constant 2 : index
    %c0_21 = arith.constant 0 : index
    %c0_22 = arith.constant 0 : index
    %41 = vector.load %arg2[%c2, %c0_21, %c0_22] : memref<3x128x128xf32, #tpu.memory_space<vmem>>, vector<1x128x128xf32>
    %42 = vector.shape_cast %41 : vector<1x128x128xf32> to vector<128x128xf32>
    %cst_23 = arith.constant dense<0.000000e+00> : vector<8x128xf32>
    %43 = tpu.matmul %40, %42, %cst_23 {dimension_numbers = #tpu.dot_dimension_numbers<[1], [0], [0], [1], [0, 0, 1, 1], [], []>} : vector<8x128xf32>, vector<128x128xf32>, vector<8x128xf32> -> vector<8x128xf32>
    %c2_24 = arith.constant 2 : index
    %c0_25 = arith.constant 0 : index
    %c0_26 = arith.constant 0 : index
    %44 = vector.load %arg3[%c2_24, %c0_25, %c0_26] : memref<3x1x128xf32, #tpu.memory_space<vmem>>, vector<1x1x128xf32>
    %45 = vector.shape_cast %44 : vector<1x1x128xf32> to vector<1x128xf32>
    %46 = vector.broadcast %45 : vector<1x128xf32> to vector<8x128xf32>
    %47 = arith.addf %43, %46 : vector<8x128xf32>
    %c0_27 = arith.constant 0 : index
    %c0_28 = arith.constant 0 : index
    %48 = vector.load %arg4[%c0_27, %c0_28] : memref<8x128xf32, #tpu.memory_space<vmem>>, vector<8x128xf32>
    tpu.vector_store %arg4[%c0_27, %c0_28], %47 {strides = array<i32>} : memref<8x128xf32, #tpu.memory_space<vmem>>, vector<8x128xf32>,
    return
  }
  func.func @transform_0(%arg0: i32) -> (i32, i32) {
    %c0_i32 = arith.constant 0 : i32
    %c0_i32_0 = arith.constant 0 : i32
    return %arg0, %c0_i32 : i32, i32
  }
  func.func @transform_1(%arg0: i32) -> (i32, i32, i32) {
    %c0_i32 = arith.constant 0 : i32
    %c0_i32_0 = arith.constant 0 : i32
    %c0_i32_1 = arith.constant 0 : i32
    %c0_i32_2 = arith.constant 0 : i32
    return %c0_i32, %c0_i32_0, %c0_i32_1 : i32, i32, i32
  }
  func.func @transform_2(%arg0: i32) -> (i32, i32, i32) {
    %c0_i32 = arith.constant 0 : i32
    %c0_i32_0 = arith.constant 0 : i32
    %c0_i32_1 = arith.constant 0 : i32
    %c0_i32_2 = arith.constant 0 : i32
    return %c0_i32, %c0_i32_0, %c0_i32_1 : i32, i32, i32
  }
  func.func @transform_3(%arg0: i32) -> (i32, i32) {
    %c0_i32 = arith.constant 0 : i32
    %c0_i32_0 = arith.constant 0 : i32
    return %arg0, %c0_i32 : i32, i32
  }
}

</mosaic_0001>

<bundles_post_ra>
// kernel: fused_mlp.1
= control target key start
LH: loop header
LB: loop body
LE: loop exit
PB: predicated region body
PF: predicated region fallthrough
CT: control target
= control target key end

     0   :  { %8 = vsyncpa [#allocation3], 0  ;;  %s729_s0 = inlined_call_operand.vmem [shape: f32[8,128], index: 0, kind: input, shape index: {}]   ;;  %s730_s1 = inlined_call_operand.hbm [shape: f32[3,128,128], index: 1, kind: input, shape index: {}]   ;;  %s731_s2 = inlined_call_operand.vmem [shape: f32[3,1,128], index: 2, kind: input, shape index: {}]   ;;  %s732_s3 = inlined_call_operand.hbm [shape: f32[8,128], index: 3, kind: output, shape index: {}]  }
   0x1   :  { %9 = vsyncpa [#allocation4], 0  ;;  %s639_s12 = smov [#allocation2]   ;;  %s591_s16 = scalar_lea.hbm %s730_s1, 6144 }
   0x2   :  { %s17_s13 = sshll.u32 %s639_s12, 4  ;;  %p592_p0 = scmp.ne.s32.totalorder %s730_s1, %s591_s16  ;;  %s18_s13 = int_to_ptr.vmem [resolvable:$true] %s17_s13 }
   0x3   :  { %p595_p1 = scmp.lt.u32.totalorder %s591_s16, %s730_s1 }
   0x5   :  { %p597_p2 = pnand %p595_p1, %p592_p0 }
   0x7   :  { %600 = shalt.err (!%p597_p2)
}
   0x8   :  { %s601_s21 = scalar_lea.vmem %s18_s13, 6144  ;;  %p606_p4 = scmp.lt.s32.totalorder %s18_s13, %s18_s13 }
   0x9   :  { %p602_p3 = scmp.ne.s32.totalorder %s18_s13, %s601_s21  ;;  %p607_p5 = scmp.lt.s32.totalorder %s601_s21, %s601_s21 }
   0xb   :  { %p608_p6 = por %p607_p5, %p606_p4 }
   0xd   :  { %p609_p7 = pnand %p608_p6, %p602_p3 }
   0xf   :  { %612 = shalt.err (!%p609_p7)
}
  0x10   :  { %s640_s22 = smov 128   ;;  %s641_s23 = smov 8  }
  0x11   :  { %23 = dma.hbm_to_vmem [thread:$0]  %s730_s1, 6144, %s18_s13, [#allocation3], %s640_s22, %s640_s22, %s641_s23  }
  0x12   :  { %635 = dma.done.wait [#allocation3], 6144  }
  0x13   :  { %636 = vsyncadd [#allocation3], 4294961152  ;;  %v642_v0 = vmov 0.0|0.0   ;;  %vm643_vm0 = vmmov 0   ;;  %v644_v1 = vmov 0.0   ;;  %v30_v2 = vld [vmem:[#allocation2] sm:$0xff] }
  0x14   :  { %508 = vmatprep.subr.bf16.mxu0 %v642_v0  ;;  %435 = vmatprep.mubr.msk.f32.mxu0 %vm643_vm0, %v644_v1  ;;  %v31_v3 = vld [vmem:[#allocation2 + $0x8] sm:$0xff]  ;;  %v32_v4 = vld [vmem:[#allocation2 + $0x10] sm:$0xff]  ;;  %v33_v6 = vld [vmem:[#allocation2 + $0x18] sm:$0xff]  ;;  %s645_s5 = smov [#allocation5]  }
  0x15   :  { %532 = vmatprep.subr.bf16.mxu1 %v642_v0  ;;  %470 = vmatprep.mubr.msk.f32.mxu1 %vm643_vm0, %v644_v1  ;;  %v509_v5 = vpack.c.bf16 %v31_v3, %v30_v2  ;;  %v512_v7 = vpack.c.bf16 %v33_v6, %v32_v4  ;;  %v34_v8 = vld [vmem:[#allocation2 + $0x20] sm:$0xff]  ;;  %v35_v9 = vld [vmem:[#allocation2 + $0x28] sm:$0xff]  ;;  %v36_v14 = vld [vmem:[#allocation2 + $0x30] sm:$0xff]  ;;  %s338_s6 = sshll.u32 %s645_s5, 4  ;;  %s339_s6 = int_to_ptr.vmem [resolvable:$true] %s338_s6 }
  0x16   :  { %v133_v10 = vld [vmem:[#allocation2 + $0x80] sm:$0xff]  ;;  %v134_v11 = vld [vmem:[#allocation2 + $0x88] sm:$0xff]  ;;  %v515_v12 = vpack.c.bf16 %v35_v9, %v34_v8  ;;  %v37_v15 = vld [vmem:[#allocation2 + $0x38] sm:$0xff]  ;;  %s613_s7 = scalar_lea.vmem %s339_s6, 128  ;;  %p618_p9 = scmp.lt.s32.totalorder %s339_s6, %s339_s6 }
  0x17   :  { %510 = vmatpush3.bf16.msra.mxu0 %v509_v5  ;;  %v533_v13 = vpack.c.bf16 %v134_v11, %v133_v10  ;;  %v518_v16 = vpack.c.bf16 %v37_v15, %v36_v14  ;;  %v38_v17 = vld [vmem:[#allocation2 + $0x40] sm:$0xff]  ;;  %v39_v18 = vld [vmem:[#allocation2 + $0x48] sm:$0xff]  ;;  %v40_v20 = vld [vmem:[#allocation2 + $0x50] sm:$0xff]  ;;  %p614_p8 = scmp.ne.s32.totalorder %s339_s6, %s613_s7  ;;  %p619_p10 = scmp.lt.s32.totalorder %s613_s7, %s613_s7 }
  0x18   :  { %511 = vmatprep.subr.bf16.mxu0 %v642_v0  ;;  %v521_v19 = vpack.c.bf16 %v39_v18, %v38_v17  ;;  %v41_v21 = vld [vmem:[#allocation2 + $0x58] sm:$0xff]  ;;  %v42_v23 = vld [vmem:[#allocation2 + $0x60] sm:$0xff]  ;;  %v43_v24 = vld [vmem:[#allocation2 + $0x68] sm:$0xff] }
  0x19   :  { %534 = vmatpush3.bf16.msra.mxu1 %v533_v13  ;;  %v524_v22 = vpack.c.bf16 %v41_v21, %v40_v20  ;;  %v527_v25 = vpack.c.bf16 %v43_v24, %v42_v23  ;;  %v44_v26 = vld [vmem:[#allocation2 + $0x70] sm:$0xff]  ;;  %v45_v27 = vld [vmem:[#allocation2 + $0x78] sm:$0xff]  ;;  %v29_v29 = vld [vmem:[%s729_s0] sm:$0xff]  ;;  %p620_p11 = por %p619_p10, %p618_p9 }
  0x1a   :  { %535 = vmatprep.subr.bf16.mxu1 %v642_v0  ;;  %v530_v28 = vpack.c.bf16 %v45_v27, %v44_v26  ;;  %v135_v30 = vld [vmem:[#allocation2 + $0x90] sm:$0xff]  ;;  %v136_v31 = vld [vmem:[#allocation2 + $0x98] sm:$0xff]  ;;  %v137_v33 = vld [vmem:[#allocation2 + $0xa0] sm:$0xff] }
  0x1b   :  { %513 = vmatpush3.bf16.msra.mxu0 %v512_v7  ;;  %v536_v32 = vpack.c.bf16 %v136_v31, %v135_v30  ;;  %v138_v34 = vld [vmem:[#allocation2 + $0xa8] sm:$0xff]  ;;  %v139_v36 = vld [vmem:[#allocation2 + $0xb0] sm:$0xff]  ;;  %v140_v37 = vld [vmem:[#allocation2 + $0xb8] sm:$0xff]  ;;  %p621_p12 = pnand %p620_p11, %p614_p8 }
  0x1c   :  { %514 = vmatprep.subr.bf16.mxu0 %v642_v0  ;;  %v539_v35 = vpack.c.bf16 %v138_v34, %v137_v33  ;;  %v542_v38 = vpack.c.bf16 %v140_v37, %v139_v36  ;;  %v141_v39 = vld [vmem:[#allocation2 + $0xc0] sm:$0xff]  ;;  %v142_v40 = vld [vmem:[#allocation2 + $0xc8] sm:$0xff]  ;;  %v143_v42 = vld [vmem:[#allocation2 + $0xd0] sm:$0xff] }
  0x1d   :  { %537 = vmatpush3.bf16.msra.mxu1 %v536_v32  ;;  %v545_v41 = vpack.c.bf16 %v142_v40, %v141_v39  ;;  %v144_v43 = vld [vmem:[#allocation2 + $0xd8] sm:$0xff]  ;;  %v145_v45 = vld [vmem:[#allocation2 + $0xe0] sm:$0xff]  ;;  %v146_v46 = vld [vmem:[#allocation2 + $0xe8] sm:$0xff] }
  0x1e   :  { %538 = vmatprep.subr.bf16.mxu1 %v642_v0  ;;  %v548_v44 = vpack.c.bf16 %v144_v43, %v143_v42  ;;  %v551_v47 = vpack.c.bf16 %v146_v46, %v145_v45  ;;  %v147_v48 = vld [vmem:[#allocation2 + $0xf0] sm:$0xff]  ;;  %v148_v49 = vld [vmem:[#allocation2 + $0xf8] sm:$0xff]  ;;  %v237_v51 = vld [vmem:[#allocation2 + $0x100] sm:$0xff] }
  0x1f   :  { %516 = vmatpush3.bf16.msra.mxu0 %v515_v12  ;;  %v554_v50 = vpack.c.bf16 %v148_v49, %v147_v48  ;;  %v238_v52 = vld [vmem:[#allocation2 + $0x108] sm:$0xff]  ;;  %v347_v54 = vld [vmem:[%s731_s2] ss:$0 sm:$0xff]  ;;  %v239_v4 = vld [vmem:[#allocation2 + $0x110] sm:$0xff] }
  0x20   :  { %517 = vmatprep.subr.bf16.mxu0 %v642_v0  ;;  %v557_v53 = vpack.c.bf16 %v238_v52, %v237_v51  ;;  %v240_v5 = vld [vmem:[#allocation2 + $0x118] sm:$0xff]  ;;  %v241_v7 = vld [vmem:[#allocation2 + $0x120] sm:$0xff]  ;;  %v242_v8 = vld [vmem:[#allocation2 + $0x128] sm:$0xff] }
  0x21   :  { %540 = vmatpush3.bf16.msra.mxu1 %v539_v35  ;;  %v560_v6 = vpack.c.bf16 %v240_v5, %v239_v4  ;;  %v563_v9 = vpack.c.bf16 %v242_v8, %v241_v7  ;;  %v243_v10 = vld [vmem:[#allocation2 + $0x130] sm:$0xff]  ;;  %v244_v11 = vld [vmem:[#allocation2 + $0x138] sm:$0xff]  ;;  %v245_v13 = vld [vmem:[#allocation2 + $0x140] sm:$0xff] }
  0x22   :  { %541 = vmatprep.subr.bf16.mxu1 %v642_v0  ;;  %v566_v12 = vpack.c.bf16 %v244_v11, %v243_v10  ;;  %v246_v14 = vld [vmem:[#allocation2 + $0x148] sm:$0xff]  ;;  %v248_v17 = vld [vmem:[#allocation2 + $0x158] sm:$0xff] }
  0x23   :  { %519 = vmatpush3.bf16.msra.mxu0 %v518_v16  ;;  %v569_v15 = vpack.c.bf16 %v246_v14, %v245_v13  ;;  %v247_v16 = vld [vmem:[#allocation2 + $0x150] sm:$0xff]  ;;  %v250_v20 = vld [vmem:[#allocation2 + $0x168] sm:$0xff]  ;;  %v252_v23 = vld [vmem:[#allocation2 + $0x178] sm:$0xff] }
  0x24   :  { %520 = vmatprep.subr.bf16.mxu0 %v642_v0  ;;  %v572_v18 = vpack.c.bf16 %v248_v17, %v247_v16 }
  0x25   :  { %543 = vmatpush3.bf16.msra.mxu1 %v542_v38 }
  0x26   :  { %544 = vmatprep.subr.bf16.mxu1 %v642_v0 }
  0x27   :  { %522 = vmatpush3.bf16.msra.mxu0 %v521_v19  ;;  %v249_v19 = vld [vmem:[#allocation2 + $0x160] sm:$0xff] }
  0x28   :  { %523 = vmatprep.subr.bf16.mxu0 %v642_v0  ;;  %v575_v21 = vpack.c.bf16 %v250_v20, %v249_v19 }
  0x29   :  { %546 = vmatpush3.bf16.msra.mxu1 %v545_v41 }
  0x2a   :  { %547 = vmatprep.subr.bf16.mxu1 %v642_v0 }
  0x2b   :  { %525 = vmatpush3.bf16.msra.mxu0 %v524_v22  ;;  %v251_v22 = vld [vmem:[#allocation2 + $0x170] sm:$0xff] }
  0x2c   :  { %526 = vmatprep.subr.bf16.mxu0 %v642_v0  ;;  %v578_v24 = vpack.c.bf16 %v252_v23, %v251_v22 }
  0x2d   :  { %549 = vmatpush3.bf16.msra.mxu1 %v548_v44 }
  0x2e   :  { %550 = vmatprep.subr.bf16.mxu1 %v642_v0 }
  0x2f   :  { %528 = vmatpush3.bf16.msra.mxu0 %v527_v25  ;;  %v349_v25 = vld [vmem:[%s731_s2 + $0x1] ss:$0 sm:$0xff] }
  0x30   :  { %529 = vmatprep.subr.bf16.mxu0 %v642_v0 }
  0x31   :  { %552 = vmatpush3.bf16.msra.mxu1 %v551_v47 }
  0x32   :  { %553 = vmatprep.subr.bf16.mxu1 %v642_v0 }
  0x33   :  { %531 = vmatpush3.bf16.msra.mxu0 %v530_v28 }
  0x34   :  { %556 = vmatprep.subr.bf16.mxu0 %v642_v0 }
  0x35   :  { %555 = vmatpush3.bf16.msra.mxu1 %v554_v50 }
  0x36   :  { %436 = vmatmul.mubr.f32.vlgmr.msra.gmra.mrb[0].mxu0 %v29_v29 }
  0x37   :  { %505 = vmatprep.mubr.msk.f32.mxu0 %vm643_vm0, %v644_v1  ;;  %558 = vmatpush3.bf16.msra.mxu0 %v557_v53 }
  0x38   :  { %559 = vmatprep.subr.bf16.mxu0 %v642_v0 }
  0x3b   :  { %561 = vmatpush3.bf16.msra.mxu0 %v560_v6 }
  0x3c   :  { %562 = vmatprep.subr.bf16.mxu0 %v642_v0 }
  0x3f   :  { %564 = vmatpush3.bf16.msra.mxu0 %v563_v9 }
  0x40   :  { %565 = vmatprep.subr.bf16.mxu0 %v642_v0 }
  0x43   :  { %567 = vmatpush3.bf16.msra.mxu0 %v566_v12 }
  0x44   :  { %568 = vmatprep.subr.bf16.mxu0 %v642_v0 }
  0x47   :  { %570 = vmatpush3.bf16.msra.mxu0 %v569_v15 }
  0x48   :  { %571 = vmatprep.subr.bf16.mxu0 %v642_v0 }
  0x4b   :  { %573 = vmatpush3.bf16.msra.mxu0 %v572_v18 }
  0x4c   :  { %574 = vmatprep.subr.bf16.mxu0 %v642_v0 }
  0x4f   :  { %576 = vmatpush3.bf16.msra.mxu0 %v575_v21 }
  0x50   :  { %577 = vmatprep.subr.bf16.mxu0 %v642_v0  ;;  %v351_v0 = vld [vmem:[%s731_s2 + $0x2] ss:$0 sm:$0xff] }
  0x53   :  { %579 = vmatpush3.bf16.msra.mxu0 %v578_v24 }
 0x109   :  { %v119_v55 = vpop.f32.mrb[0].mxu0 }
 0x10a   :  { %v120_v56 = vadd.f32 %v347_v54, %v119_v55  ;;  %v437_v57 = vpop.f32.mrb[1].mxu0 }
 0x10c   :  { %v123_v58 = vmul.f32 %v120_v56, %v120_v56  ;;  %v124_v1 = vmul.f32 0.5, %v120_v56 }
 0x10e   :  { %v125_v59 = vmul.f32 %v123_v58, %v120_v56 }
 0x110   :  { %v126_v60 = vmul.f32 0.044715, %v125_v59 }
 0x112   :  { %v127_v61 = vadd.f32 %v126_v60, %v120_v56 }
 0x114   :  { %v128_v62 = vmul.f32 0.7978846, %v127_v61 }
 0x116   :  { %587 = vtanh.f32 %v128_v62 }
 0x120   :  { %v588_v63 = vpop.eup %587 }
 0x121   :  { %v130_v2 = vadd.f32 1.0, %v588_v63 }
 0x123   :  { %v131_v3 = vmul.f32 %v130_v2, %v124_v1 }
 0x125   :  { %471 = vmatmul.mubr.f32.vlgmr.msra.gmra.mrb[0].mxu1 %v131_v3 }
 0x1f8   :  { %v223_v26 = vpop.f32.mrb[0].mxu1 }
 0x1f9   :  { %v224_v27 = vadd.f32 %v349_v25, %v223_v26  ;;  %v472_v28 = vpop.f32.mrb[1].mxu1 }
 0x1fb   :  { %v227_v29 = vmul.f32 %v224_v27, %v224_v27  ;;  %v228_v35 = vmul.f32 0.5, %v224_v27 }
 0x1fd   :  { %v229_v30 = vmul.f32 %v227_v29, %v224_v27 }
 0x1ff   :  { %v230_v31 = vmul.f32 0.044715, %v229_v30 }
 0x201   :  { %v231_v32 = vadd.f32 %v230_v31, %v224_v27 }
 0x203   :  { %v232_v33 = vmul.f32 0.7978846, %v231_v32 }
 0x205   :  { %589 = vtanh.f32 %v232_v33 }
 0x20f   :  { %v590_v34 = vpop.eup %589 }
 0x210   :  { %v234_v36 = vadd.f32 1.0, %v590_v34 }
 0x212   :  { %v235_v37 = vmul.f32 %v234_v36, %v228_v35 }
 0x214   :  { %506 = vmatmul.mubr.f32.vlgmr.msra.gmra.mrb[2].mxu0 %v235_v37 }
 0x2e7   :  { %v327_v38 = vpop.f32.mrb[2].mxu0 }
 0x2e8   :  { %v328_v39 = vadd.f32 %v351_v0, %v327_v38  ;;  %v507_v40 = vpop.f32.mrb[3].mxu0 }
 0x2ea   :  { %331 = vst [vmem:[#allocation5] sm:$0xff] %v328_v39 }
 0x2eb   :  { %624 = shalt.err (!%p621_p12)
}
 0x2ec   :  { %s625_s10 = scalar_lea.hbm %s732_s3, 128 }
 0x2ed   :  { %p626_p13 = scmp.ne.s32.totalorder %s732_s3, %s625_s10  ;;  %p629_p0 = scmp.lt.u32.totalorder %s625_s10, %s732_s3 }
 0x2ef   :  { %p631_p1 = pnand %p629_p0, %p626_p13 }
 0x2f1   :  { %634 = shalt.err (!%p631_p1)
}
 0x2f2   :  { %341 = dma.vmem_to_hbm [thread:$0]  %s339_s6, 128, %s732_s3, [#allocation4]  }
 0x2f3   :  { %637 = dma.done.wait [#allocation4], 128  }
 0x2f4   :  { %638 = vsyncadd [#allocation4], 4294967168 }
 0x2f5   :  { %345 = vsyncpa [#allocation3], 1 }
 0x2f6   :  { %346 = vsyncpa [#allocation4], 1 }

</bundles_post_ra>
